<compile_context>
chip_gen: v6e
topology: v6e:2x2x1
jax: 0.10.0
libtpu: 0.0.40
codegen_flags: <defaults>
</compile_context>

<pallas_src>
import functools

import jax
import jax.numpy as jnp
from jax.experimental import pallas as pl
from jax.experimental.pallas import tpu as pltpu

LANE = 128
SUBLANE = 8


def _round_up(n, m):
    return ((n + m - 1) // m) * m


def _pad2d(a, rows, cols):
    return jnp.pad(a, ((0, rows - a.shape[0]), (0, cols - a.shape[1])))


def _vae_kernel(x_ref,
                w1_ref, b1_ref, w2_ref, b2_ref, w3_ref, b3_ref,
                w4_ref, b4_ref, w5_ref, b5_ref, w6_ref, b6_ref,
                msr_ref, mg_ref, *, hid_p):
    # ----- encoder -----
    x = x_ref[...].astype(jnp.bfloat16)
    h = jnp.dot(x, w1_ref[...], preferred_element_type=jnp.float32) + b1_ref[...]
    h = jnp.maximum(h, 0.0).astype(jnp.bfloat16)
    h = jnp.dot(h, w2_ref[...], preferred_element_type=jnp.float32) + b2_ref[...]
    h = jnp.maximum(h, 0.0).astype(jnp.bfloat16)

    # fused mean/scale head: one [TB, 2*hid_p] matmul; softplus only on the
    # scale half (lanes >= hid_p), identity on the mean half.
    msr = jnp.dot(h, w3_ref[...], preferred_element_type=jnp.float32) + b3_ref[...]
    lane = jax.lax.broadcasted_iota(jnp.int32, msr.shape, 1)
    # softplus(x) = max(x, 0) + log1p(exp(-|x|))  (numerically stable, EUP ops)
    softplus = jnp.maximum(msr, 0.0) + jnp.log1p(jnp.exp(-jnp.abs(msr)))
    msr_ref[...] = jnp.where(lane >= hid_p, softplus, msr)

    # ----- reparameterization (eval mode): z = mr -----
    # TODO(synk): training mode (z = mr + eps*sr) would need pltpu.prng_seed +
    # pltpu.stateful_normal and cannot match torch.randn_like bit-for-bit.
    z = msr[:, :hid_p].astype(jnp.bfloat16)

    # ----- decoder -----
    d = jnp.dot(z, w4_ref[...], preferred_element_type=jnp.float32) + b4_ref[...]
    d = jnp.maximum(d, 0.0).astype(jnp.bfloat16)
    d = jnp.dot(d, w5_ref[...], preferred_element_type=jnp.float32) + b5_ref[...]
    d = jnp.maximum(d, 0.0).astype(jnp.bfloat16)
    logits = jnp.dot(d, w6_ref[...], preferred_element_type=jnp.float32) + b6_ref[...]
    mg_ref[...] = jax.nn.sigmoid(logits)


def vae_forward(x, params, *, max_tb=512):
    """x: [B, in_dim] float32. params: dict of [fan_in, fan_out] f32 weights and
    [1, fan_out] f32 biases (torch Linear layout, pre-transposed)."""
    B, in_dim = x.shape
    mid_dim = params["w1"].shape[1]
    hid_dim = params["w4"].shape[0]

    # pad every feature dim to a lane multiple (128) so matmuls and output
    # stores are lane-dense.
    in_p = _round_up(in_dim, LANE)
    mid_p = _round_up(mid_dim, LANE)
    hid_p = _round_up(hid_dim, LANE)

    # batch tile: multiple of 8, capped at max_tb so per-step blocks (with
    # double buffering) stay well inside the v7x 64 MiB VMEM budget.
    tb = min(max_tb, _round_up(B, SUBLANE))
    b_p = _round_up(B, tb)

    x_p = _pad2d(x, b_p, in_p)

    bf16 = jnp.bfloat16
    w1 = _pad2d(params["w1"], in_p, mid_p).astype(bf16)
    b1 = _pad2d(params["b1"], 1, mid_p)
    w2 = _pad2d(params["w2"], mid_p, mid_p).astype(bf16)
    b2 = _pad2d(params["b2"], 1, mid_p)
    # fused head: pad the mean and scale halves separately, then concat so the
    # mean occupies lanes [0, hid_p) and the scale lanes [hid_p, 2*hid_p).
    w3m, w3s = params["w3"][:, :hid_dim], params["w3"][:, hid_dim:]
    b3m, b3s = params["b3"][:, :hid_dim], params["b3"][:, hid_dim:]
    w3 = jnp.concatenate(
        [_pad2d(w3m, mid_p, hid_p), _pad2d(w3s, mid_p, hid_p)], axis=1).astype(bf16)
    b3 = jnp.concatenate([_pad2d(b3m, 1, hid_p), _pad2d(b3s, 1, hid_p)], axis=1)
    w4 = _pad2d(params["w4"], hid_p, mid_p).astype(bf16)
    b4 = _pad2d(params["b4"], 1, mid_p)
    w5 = _pad2d(params["w5"], mid_p, mid_p).astype(bf16)
    b5 = _pad2d(params["b5"], 1, mid_p)
    w6 = _pad2d(params["w6"], mid_p, in_p).astype(bf16)
    b6 = _pad2d(params["b6"], 1, in_p)

    args = (x_p, w1, b1, w2, b2, w3, b3, w4, b4, w5, b5, w6, b6)

    def resident(a):
        # whole array VMEM-resident across the batch grid (constant block idx)
        return pl.BlockSpec(a.shape, lambda i: (0, 0))

    in_specs = [pl.BlockSpec((tb, in_p), lambda i: (i, 0))]
    in_specs += [resident(a) for a in args[1:]]
    out_specs = (
        pl.BlockSpec((tb, 2 * hid_p), lambda i: (i, 0)),
        pl.BlockSpec((tb, in_p), lambda i: (i, 0)),
    )

    flops = 2 * b_p * (in_p * mid_p + mid_p * mid_p + mid_p * 2 * hid_p
                       + hid_p * mid_p + mid_p * mid_p + mid_p * in_p)
    transcendentals = b_p * (2 * 2 * hid_p + in_p)  # softplus exp/log1p + sigmoid
    bytes_accessed = (x_p.size * x_p.dtype.itemsize
                      + sum(a.size * a.dtype.itemsize for a in args[1:])
                      + b_p * (2 * hid_p + in_p) * 4)

    msr, mg = pl.pallas_call(
        functools.partial(_vae_kernel, hid_p=hid_p),
        grid=(b_p // tb,),
        out_shape=(
            jax.ShapeDtypeStruct((b_p, 2 * hid_p), jnp.float32),
            jax.ShapeDtypeStruct((b_p, in_p), jnp.float32),
        ),
        in_specs=in_specs,
        out_specs=out_specs,
        compiler_params=pltpu.CompilerParams(
            dimension_semantics=("parallel",)),
        cost_estimate=pl.CostEstimate(
            flops=flops,
            transcendentals=transcendentals,
            bytes_accessed=bytes_accessed),
    )(*args)

    mr = msr[:B, :hid_dim]
    sr = msr[:B, hid_p:hid_p + hid_dim]
    mg_out = mg[:B, :in_dim]
    return mr, sr, mg_out


def init_params(key, in_dim, mid_dim, hid_dim):
    """Deterministic parameter init. Weights stored as [fan_in, fan_out]."""
    ks = jax.random.split(key, 12)

    def lin(kw, kb, fan_in, fan_out):
        bound = 1.0 / (fan_in ** 0.5)
        w = jax.random.uniform(kw, (fan_in, fan_out), jnp.float32, -bound, bound)
        b = jax.random.uniform(kb, (1, fan_out), jnp.float32, -bound, bound)
        return w, b

    w1, b1 = lin(ks[0], ks[1], in_dim, mid_dim)
    w2, b2 = lin(ks[2], ks[3], mid_dim, mid_dim)
    w3, b3 = lin(ks[4], ks[5], mid_dim, 2 * hid_dim)   # mean | scale heads fused
    w4, b4 = lin(ks[6], ks[7], hid_dim, mid_dim)
    w5, b5 = lin(ks[8], ks[9], mid_dim, mid_dim)
    w6, b6 = lin(ks[10], ks[11], mid_dim, in_dim)
    return dict(w1=w1, b1=b1, w2=w2, b2=b2, w3=w3, b3=b3,
                w4=w4, b4=b4, w5=w5, b5=b5, w6=w6, b6=b6)


def vae_forward_ref(x, p):
    """Pure-JAX f32 reference matching the torch module (eval mode)."""
    hid_dim = p["w4"].shape[0]
    h = jnp.maximum(x @ p["w1"] + p["b1"], 0.0)
    h = jnp.maximum(h @ p["w2"] + p["b2"], 0.0)
    msr = h @ p["w3"] + p["b3"]
    mr, sr_ = msr[:, :hid_dim], msr[:, hid_dim:]
    sr = jax.nn.softplus(sr_)
    z = mr
    d = jnp.maximum(z @ p["w4"] + p["b4"], 0.0)
    d = jnp.maximum(d @ p["w5"] + p["b5"], 0.0)
    mg = jax.nn.sigmoid(d @ p["w6"] + p["b6"])
    return mr, sr, mg


if __name__ == "__main__":
    B, in_dim, mid_dim, hid_dim = 8, 64, 32, 16

    key = jax.random.PRNGKey(0)
    kx, kp = jax.random.split(key)
    x = jax.random.uniform(kx, (B, in_dim), jnp.float32)  # bernoulli-ish inputs
    params = init_params(kp, in_dim, mid_dim, hid_dim)

    mr, sr, mg = vae_forward(x, params)
    jax.block_until_ready((mr, sr, mg))

    mr_r, sr_r, mg_r = vae_forward_ref(x, params)
    assert mr.shape == (B, hid_dim) and sr.shape == (B, hid_dim) and mg.shape == (B, in_dim)
    # bf16 MXU operands with f32 accumulation -> loosened tolerances vs f32 ref
    assert jnp.allclose(mr, mr_r, atol=5e-2, rtol=5e-2)
    assert jnp.allclose(sr, sr_r, atol=5e-2, rtol=5e-2)
    assert jnp.allclose(mg, mg_r, atol=5e-2, rtol=5e-2)

    print("KERNEL_OK")
</pallas_src>

<mosaic_0001>
module attributes {stable_mosaic.version = 11 : i64} {
  func.func @_vae_kernel(%arg0: i32, %arg1: memref<8x128xf32, #tpu.memory_space<vmem>>, %arg2: memref<128x128xbf16, #tpu.memory_space<vmem>>, %arg3: memref<1x128xf32, #tpu.memory_space<vmem>>, %arg4: memref<128x128xbf16, #tpu.memory_space<vmem>>, %arg5: memref<1x128xf32, #tpu.memory_space<vmem>>, %arg6: memref<128x256xbf16, #tpu.memory_space<vmem>>, %arg7: memref<1x256xf32, #tpu.memory_space<vmem>>, %arg8: memref<128x128xbf16, #tpu.memory_space<vmem>>, %arg9: memref<1x128xf32, #tpu.memory_space<vmem>>, %arg10: memref<128x128xbf16, #tpu.memory_space<vmem>>, %arg11: memref<1x128xf32, #tpu.memory_space<vmem>>, %arg12: memref<128x128xbf16, #tpu.memory_space<vmem>>, %arg13: memref<1x128xf32, #tpu.memory_space<vmem>>, %arg14: memref<8x256xf32, #tpu.memory_space<vmem>>, %arg15: memref<8x128xf32, #tpu.memory_space<vmem>>) attributes {dimension_semantics = [#tpu.dimension_semantics<parallel>], iteration_bounds = array<i64: 1>, scalar_prefetch = 0 : i64, scratch_operands = 0 : i64, tpu.core_type = #tpu.core_type<tc>, window_params = [{transform_indices = @transform_0, window_bounds = array<i64: 8, 128>}, {pipeline_mode = #tpu.pipeline_mode<synchronous>, transform_indices = @transform_1, window_bounds = array<i64: 128, 128>}, {pipeline_mode = #tpu.pipeline_mode<synchronous>, transform_indices = @transform_2, window_bounds = array<i64: 1, 128>}, {pipeline_mode = #tpu.pipeline_mode<synchronous>, transform_indices = @transform_3, window_bounds = array<i64: 128, 128>}, {pipeline_mode = #tpu.pipeline_mode<synchronous>, transform_indices = @transform_4, window_bounds = array<i64: 1, 128>}, {pipeline_mode = #tpu.pipeline_mode<synchronous>, transform_indices = @transform_5, window_bounds = array<i64: 128, 256>}, {pipeline_mode = #tpu.pipeline_mode<synchronous>, transform_indices = @transform_6, window_bounds = array<i64: 1, 256>}, {pipeline_mode = #tpu.pipeline_mode<synchronous>, transform_indices = @transform_7, window_bounds = array<i64: 128, 128>}, {pipeline_mode = #tpu.pipeline_mode<synchronous>, transform_indices = @transform_8, window_bounds = array<i64: 1, 128>}, {pipeline_mode = #tpu.pipeline_mode<synchronous>, transform_indices = @transform_9, window_bounds = array<i64: 128, 128>}, {pipeline_mode = #tpu.pipeline_mode<synchronous>, transform_indices = @transform_10, window_bounds = array<i64: 1, 128>}, {pipeline_mode = #tpu.pipeline_mode<synchronous>, transform_indices = @transform_11, window_bounds = array<i64: 128, 128>}, {pipeline_mode = #tpu.pipeline_mode<synchronous>, transform_indices = @transform_12, window_bounds = array<i64: 1, 128>}, {transform_indices = @transform_13, window_bounds = array<i64: 8, 256>}, {transform_indices = @transform_14, window_bounds = array<i64: 8, 128>}]} {
    %c0 = arith.constant 0 : index
    %c0_0 = arith.constant 0 : index
    %0 = vector.load %arg1[%c0, %c0_0] : memref<8x128xf32, #tpu.memory_space<vmem>>, vector<8x128xf32>
    %1 = arith.truncf %0 : vector<8x128xf32> to vector<8x128xbf16>
    %c0_1 = arith.constant 0 : index
    %c0_2 = arith.constant 0 : index
    %2 = vector.load %arg2[%c0_1, %c0_2] : memref<128x128xbf16, #tpu.memory_space<vmem>>, vector<128x128xbf16>
    %cst = arith.constant dense<0.000000e+00> : vector<8x128xf32>
    %3 = tpu.matmul %1, %2, %cst {dimension_numbers = #tpu.dot_dimension_numbers<[1], [0], [0], [1], [0, 0, 1, 1], [], []>} : vector<8x128xbf16>, vector<128x128xbf16>, vector<8x128xf32> -> vector<8x128xf32>
    %c0_3 = arith.constant 0 : index
    %c0_4 = arith.constant 0 : index
    %4 = vector.load %arg3[%c0_3, %c0_4] : memref<1x128xf32, #tpu.memory_space<vmem>>, vector<1x128xf32>
    %5 = vector.broadcast %4 : vector<1x128xf32> to vector<8x128xf32>
    %6 = arith.addf %3, %5 : vector<8x128xf32>
    %cst_5 = arith.constant 0.000000e+00 : f32
    %7 = vector.broadcast %cst_5 : f32 to vector<8x128xf32>
    %8 = arith.maximumf %6, %7 : vector<8x128xf32>
    %9 = arith.truncf %8 : vector<8x128xf32> to vector<8x128xbf16>
    %c0_6 = arith.constant 0 : index
    %c0_7 = arith.constant 0 : index
    %10 = vector.load %arg4[%c0_6, %c0_7] : memref<128x128xbf16, #tpu.memory_space<vmem>>, vector<128x128xbf16>
    %cst_8 = arith.constant dense<0.000000e+00> : vector<8x128xf32>
    %11 = tpu.matmul %9, %10, %cst_8 {dimension_numbers = #tpu.dot_dimension_numbers<[1], [0], [0], [1], [0, 0, 1, 1], [], []>} : vector<8x128xbf16>, vector<128x128xbf16>, vector<8x128xf32> -> vector<8x128xf32>
    %c0_9 = arith.constant 0 : index
    %c0_10 = arith.constant 0 : index
    %12 = vector.load %arg5[%c0_9, %c0_10] : memref<1x128xf32, #tpu.memory_space<vmem>>, vector<1x128xf32>
    %13 = vector.broadcast %12 : vector<1x128xf32> to vector<8x128xf32>
    %14 = arith.addf %11, %13 : vector<8x128xf32>
    %cst_11 = arith.constant 0.000000e+00 : f32
    %15 = vector.broadcast %cst_11 : f32 to vector<8x128xf32>
    %16 = arith.maximumf %14, %15 : vector<8x128xf32>
    %17 = arith.truncf %16 : vector<8x128xf32> to vector<8x128xbf16>
    %c0_12 = arith.constant 0 : index
    %c0_13 = arith.constant 0 : index
    %18 = vector.load %arg6[%c0_12, %c0_13] : memref<128x256xbf16, #tpu.memory_space<vmem>>, vector<128x256xbf16>
    %cst_14 = arith.constant dense<0.000000e+00> : vector<8x256xf32>
    %19 = tpu.matmul %17, %18, %cst_14 {dimension_numbers = #tpu.dot_dimension_numbers<[1], [0], [0], [1], [0, 0, 1, 1], [], []>} : vector<8x128xbf16>, vector<128x256xbf16>, vector<8x256xf32> -> vector<8x256xf32>
    %c0_15 = arith.constant 0 : index
    %c0_16 = arith.constant 0 : index
    %20 = vector.load %arg7[%c0_15, %c0_16] : memref<1x256xf32, #tpu.memory_space<vmem>>, vector<1x256xf32>
    %21 = vector.broadcast %20 : vector<1x256xf32> to vector<8x256xf32>
    %22 = arith.addf %19, %21 : vector<8x256xf32>
    %23 = tpu.iota {dimensions = array<i32: 1>} : vector<8x256xi32>
    %cst_17 = arith.constant 0.000000e+00 : f32
    %24 = vector.broadcast %cst_17 : f32 to vector<8x256xf32>
    %25 = arith.maximumf %22, %24 : vector<8x256xf32>
    %26 = math.absf %22 : vector<8x256xf32>
    %cst_18 = arith.constant 0.000000e+00 : f32
    %27 = vector.broadcast %cst_18 : f32 to vector<8x256xf32>
    %28 = arith.subf %27, %26 : vector<8x256xf32>
    %29 = math.exp %28 : vector<8x256xf32>
    %30 = math.log1p %29 : vector<8x256xf32>
    %31 = arith.addf %25, %30 : vector<8x256xf32>
    %c128_i32 = arith.constant 128 : i32
    %32 = vector.broadcast %c128_i32 : i32 to vector<8x256xi32>
    %33 = arith.cmpi sge, %23, %32 : vector<8x256xi32>
    %34 = arith.select %33, %31, %22 : vector<8x256xi1>, vector<8x256xf32>
    %c0_19 = arith.constant 0 : index
    %c0_20 = arith.constant 0 : index
    %35 = vector.load %arg14[%c0_19, %c0_20] : memref<8x256xf32, #tpu.memory_space<vmem>>, vector<8x256xf32>
    tpu.vector_store %arg14[%c0_19, %c0_20], %34 {strides = array<i32>} : memref<8x256xf32, #tpu.memory_space<vmem>>, vector<8x256xf32>,
    %36 = vector.extract_strided_slice %22 {offsets = [0, 0], sizes = [8, 128], strides = [1, 1]} : vector<8x256xf32> to vector<8x128xf32>
    %37 = arith.truncf %36 : vector<8x128xf32> to vector<8x128xbf16>
    %c0_21 = arith.constant 0 : index
    %c0_22 = arith.constant 0 : index
    %38 = vector.load %arg8[%c0_21, %c0_22] : memref<128x128xbf16, #tpu.memory_space<vmem>>, vector<128x128xbf16>
    %cst_23 = arith.constant dense<0.000000e+00> : vector<8x128xf32>
    %39 = tpu.matmul %37, %38, %cst_23 {dimension_numbers = #tpu.dot_dimension_numbers<[1], [0], [0], [1], [0, 0, 1, 1], [], []>} : vector<8x128xbf16>, vector<128x128xbf16>, vector<8x128xf32> -> vector<8x128xf32>
    %c0_24 = arith.constant 0 : index
    %c0_25 = arith.constant 0 : index
    %40 = vector.load %arg9[%c0_24, %c0_25] : memref<1x128xf32, #tpu.memory_space<vmem>>, vector<1x128xf32>
    %41 = vector.broadcast %40 : vector<1x128xf32> to vector<8x128xf32>
    %42 = arith.addf %39, %41 : vector<8x128xf32>
    %cst_26 = arith.constant 0.000000e+00 : f32
    %43 = vector.broadcast %cst_26 : f32 to vector<8x128xf32>
    %44 = arith.maximumf %42, %43 : vector<8x128xf32>
    %45 = arith.truncf %44 : vector<8x128xf32> to vector<8x128xbf16>
    %c0_27 = arith.constant 0 : index
    %c0_28 = arith.constant 0 : index
    %46 = vector.load %arg10[%c0_27, %c0_28] : memref<128x128xbf16, #tpu.memory_space<vmem>>, vector<128x128xbf16>
    %cst_29 = arith.constant dense<0.000000e+00> : vector<8x128xf32>
    %47 = tpu.matmul %45, %46, %cst_29 {dimension_numbers = #tpu.dot_dimension_numbers<[1], [0], [0], [1], [0, 0, 1, 1], [], []>} : vector<8x128xbf16>, vector<128x128xbf16>, vector<8x128xf32> -> vector<8x128xf32>
    %c0_30 = arith.constant 0 : index
    %c0_31 = arith.constant 0 : index
    %48 = vector.load %arg11[%c0_30, %c0_31] : memref<1x128xf32, #tpu.memory_space<vmem>>, vector<1x128xf32>
    %49 = vector.broadcast %48 : vector<1x128xf32> to vector<8x128xf32>
    %50 = arith.addf %47, %49 : vector<8x128xf32>
    %cst_32 = arith.constant 0.000000e+00 : f32
    %51 = vector.broadcast %cst_32 : f32 to vector<8x128xf32>
    %52 = arith.maximumf %50, %51 : vector<8x128xf32>
    %53 = arith.truncf %52 : vector<8x128xf32> to vector<8x128xbf16>
    %c0_33 = arith.constant 0 : index
    %c0_34 = arith.constant 0 : index
    %54 = vector.load %arg12[%c0_33, %c0_34] : memref<128x128xbf16, #tpu.memory_space<vmem>>, vector<128x128xbf16>
    %cst_35 = arith.constant dense<0.000000e+00> : vector<8x128xf32>
    %55 = tpu.matmul %53, %54, %cst_35 {dimension_numbers = #tpu.dot_dimension_numbers<[1], [0], [0], [1], [0, 0, 1, 1], [], []>} : vector<8x128xbf16>, vector<128x128xbf16>, vector<8x128xf32> -> vector<8x128xf32>
    %c0_36 = arith.constant 0 : index
    %c0_37 = arith.constant 0 : index
    %56 = vector.load %arg13[%c0_36, %c0_37] : memref<1x128xf32, #tpu.memory_space<vmem>>, vector<1x128xf32>
    %57 = vector.broadcast %56 : vector<1x128xf32> to vector<8x128xf32>
    %58 = arith.addf %55, %57 : vector<8x128xf32>
    %59 = arith.negf %58 : vector<8x128xf32>
    %60 = math.exp %59 : vector<8x128xf32>
    %cst_38 = arith.constant 1.000000e+00 : f32
    %61 = vector.broadcast %cst_38 : f32 to vector<8x128xf32>
    %62 = arith.addf %61, %60 : vector<8x128xf32>
    %63 = arith.divf %61, %62 : vector<8x128xf32>
    %c0_39 = arith.constant 0 : index
    %c0_40 = arith.constant 0 : index
    %64 = vector.load %arg15[%c0_39, %c0_40] : memref<8x128xf32, #tpu.memory_space<vmem>>, vector<8x128xf32>
    tpu.vector_store %arg15[%c0_39, %c0_40], %63 {strides = array<i32>} : memref<8x128xf32, #tpu.memory_space<vmem>>, vector<8x128xf32>,
    return
  }
  func.func @transform_0(%arg0: i32) -> (i32, i32) {
    %c0_i32 = arith.constant 0 : i32
    %c0_i32_0 = arith.constant 0 : i32
    return %arg0, %c0_i32 : i32, i32
  }
  func.func @transform_1(%arg0: i32) -> (i32, i32) {
    %c0_i32 = arith.constant 0 : i32
    %c0_i32_0 = arith.constant 0 : i32
    %c0_i32_1 = arith.constant 0 : i32
    return %c0_i32, %c0_i32_0 : i32, i32
  }
  func.func @transform_2(%arg0: i32) -> (i32, i32) {
    %c0_i32 = arith.constant 0 : i32
    %c0_i32_0 = arith.constant 0 : i32
    %c0_i32_1 = arith.constant 0 : i32
    return %c0_i32, %c0_i32_0 : i32, i32
  }
  func.func @transform_3(%arg0: i32) -> (i32, i32) {
    %c0_i32 = arith.constant 0 : i32
    %c0_i32_0 = arith.constant 0 : i32
    %c0_i32_1 = arith.constant 0 : i32
    return %c0_i32, %c0_i32_0 : i32, i32
  }
  func.func @transform_4(%arg0: i32) -> (i32, i32) {
    %c0_i32 = arith.constant 0 : i32
    %c0_i32_0 = arith.constant 0 : i32
    %c0_i32_1 = arith.constant 0 : i32
    return %c0_i32, %c0_i32_0 : i32, i32
  }
  func.func @transform_5(%arg0: i32) -> (i32, i32) {
    %c0_i32 = arith.constant 0 : i32
    %c0_i32_0 = arith.constant 0 : i32
    %c0_i32_1 = arith.constant 0 : i32
    return %c0_i32, %c0_i32_0 : i32, i32
  }
  func.func @transform_6(%arg0: i32) -> (i32, i32) {
    %c0_i32 = arith.constant 0 : i32
    %c0_i32_0 = arith.constant 0 : i32
    %c0_i32_1 = arith.constant 0 : i32
    return %c0_i32, %c0_i32_0 : i32, i32
  }
  func.func @transform_7(%arg0: i32) -> (i32, i32) {
    %c0_i32 = arith.constant 0 : i32
    %c0_i32_0 = arith.constant 0 : i32
    %c0_i32_1 = arith.constant 0 : i32
    return %c0_i32, %c0_i32_0 : i32, i32
  }
  func.func @transform_8(%arg0: i32) -> (i32, i32) {
    %c0_i32 = arith.constant 0 : i32
    %c0_i32_0 = arith.constant 0 : i32
    %c0_i32_1 = arith.constant 0 : i32
    return %c0_i32, %c0_i32_0 : i32, i32
  }
  func.func @transform_9(%arg0: i32) -> (i32, i32) {
    %c0_i32 = arith.constant 0 : i32
    %c0_i32_0 = arith.constant 0 : i32
    %c0_i32_1 = arith.constant 0 : i32
    return %c0_i32, %c0_i32_0 : i32, i32
  }
  func.func @transform_10(%arg0: i32) -> (i32, i32) {
    %c0_i32 = arith.constant 0 : i32
    %c0_i32_0 = arith.constant 0 : i32
    %c0_i32_1 = arith.constant 0 : i32
    return %c0_i32, %c0_i32_0 : i32, i32
  }
  func.func @transform_11(%arg0: i32) -> (i32, i32) {
    %c0_i32 = arith.constant 0 : i32
    %c0_i32_0 = arith.constant 0 : i32
    %c0_i32_1 = arith.constant 0 : i32
    return %c0_i32, %c0_i32_0 : i32, i32
  }
  func.func @transform_12(%arg0: i32) -> (i32, i32) {
    %c0_i32 = arith.constant 0 : i32
    %c0_i32_0 = arith.constant 0 : i32
    %c0_i32_1 = arith.constant 0 : i32
    return %c0_i32, %c0_i32_0 : i32, i32
  }
  func.func @transform_13(%arg0: i32) -> (i32, i32) {
    %c0_i32 = arith.constant 0 : i32
    %c0_i32_0 = arith.constant 0 : i32
    return %arg0, %c0_i32 : i32, i32
  }
  func.func @transform_14(%arg0: i32) -> (i32, i32) {
    %c0_i32 = arith.constant 0 : i32
    %c0_i32_0 = arith.constant 0 : i32
    return %arg0, %c0_i32 : i32, i32
  }
}

</mosaic_0001>

<bundles_post_ra>
// kernel: tpu_custom_call.1
= control target key start
LH: loop header
LB: loop body
LE: loop exit
PB: predicated region body
PF: predicated region fallthrough
CT: control target
= control target key end

     0   :  { %20 = vsyncpa [#allocation3], 0  ;;  %s1623_s0 = inlined_call_operand.hbm [shape: f32[8,128], index: 0, kind: input, shape index: {}]   ;;  %s1624_s1 = inlined_call_operand.hbm [shape: bf16[128,128], index: 1, kind: input, shape index: {}]   ;;  %s1625_s2 = inlined_call_operand.vmem [shape: f32[1,128], index: 2, kind: input, shape index: {}]   ;;  %s1626_s3 = inlined_call_operand.hbm [shape: bf16[128,128], index: 3, kind: input, shape index: {}]   ;;  %s1627_s4 = inlined_call_operand.vmem [shape: f32[1,128], index: 4, kind: input, shape index: {}]   ;;  %s1628_s5 = inlined_call_operand.hbm [shape: bf16[128,256], index: 5, kind: input, shape index: {}]   ;;  %s1629_s6 = inlined_call_operand.vmem [shape: f32[1,256], index: 6, kind: input, shape index: {}]   ;;  %s1630_s7 = inlined_call_operand.hbm [shape: bf16[128,128], index: 7, kind: input, shape index: {}]   ;;  %s1631_s8 = inlined_call_operand.vmem [shape: f32[1,128], index: 8, kind: input, shape index: {}]   ;;  %s1632_s9 = inlined_call_operand.hbm [shape: bf16[128,128], index: 9, kind: input, shape index: {}]   ;;  %s1633_s10 = inlined_call_operand.vmem [shape: f32[1,128], index: 10, kind: input, shape index: {}]   ;;  %s1634_s11 = inlined_call_operand.hbm [shape: bf16[128,128], index: 11, kind: input, shape index: {}]   ;;  %s1635_s12 = inlined_call_operand.vmem [shape: f32[1,128], index: 12, kind: input, shape index: {}]   ;;  %s1636_s13 = inlined_call_operand.hbm [shape: f32[8,256], index: 13, kind: output, shape index: {0}]   ;;  %s1637_s14 = inlined_call_operand.hbm [shape: f32[8,128], index: 14, kind: output, shape index: {1}]  }
   0x1   :  { %21 = vsyncpa [#allocation6], 0 }
   0x2   :  { %22 = vsyncpa [#allocation9], 0 }
   0x3   :  { %23 = vsyncpa [#allocation12], 0 }
   0x4   :  { %24 = vsyncpa [#allocation4], 0 }
   0x5   :  { %25 = vsyncpa [#allocation16], 0  ;;  %s1422_s29 = smov [#allocation5]  }
   0x6   :  { %s41_s30 = sshll.u32 %s1422_s29, 4  ;;  %s42_s30 = int_to_ptr.vmem [resolvable:$true] %s41_s30 }
   0x7   :  { %s1238_s15 = scalar_lea.vmem %s42_s30, 1024  ;;  %p1243_p1 = scmp.lt.s32.totalorder %s42_s30, %s42_s30 }
   0x8   :  { %p1239_p0 = scmp.ne.s32.totalorder %s42_s30, %s1238_s15  ;;  %p1244_p2 = scmp.lt.s32.totalorder %s1238_s15, %s1238_s15 }
   0xa   :  { %p1245_p3 = por %p1244_p2, %p1243_p1 }
   0xc   :  { %p1246_p4 = pnand %p1245_p3, %p1239_p0 }
   0xe   :  { %1249 = shalt.err (!%p1246_p4)
}
   0xf   :  { %s1423_s16 = smov 64   ;;  %s1424_s17 = smov 4  }
  0x10   :  { %47 = dma.hbm_to_vmem [thread:$0]  %s1624_s1, 1024, %s42_s30, [#allocation6], %s1423_s16, %s1423_s16, %s1424_s17  }
  0x11   :  { %s1425_s20 = smov [#allocation8]  }
  0x12   :  { %s69_s21 = sshll.u32 %s1425_s20, 4  ;;  %s70_s21 = int_to_ptr.vmem [resolvable:$true] %s69_s21 }
  0x13   :  { %s1258_s22 = scalar_lea.vmem %s70_s21, 2048  ;;  %p1263_p6 = scmp.lt.s32.totalorder %s70_s21, %s70_s21 }
  0x14   :  { %p1259_p5 = scmp.ne.s32.totalorder %s70_s21, %s1258_s22  ;;  %p1264_p7 = scmp.lt.s32.totalorder %s1258_s22, %s1258_s22 }
  0x16   :  { %p1265_p8 = por %p1264_p7, %p1263_p6 }
  0x18   :  { %p1266_p9 = pnand %p1265_p8, %p1259_p5 }
  0x1a   :  { %1269 = shalt.err (!%p1266_p9)
}
  0x1b   :  { %s1426_s23 = smov 128   ;;  %s1427_s24 = smov 8  }
  0x1c   :  { %75 = dma.hbm_to_vmem [thread:$0]  %s1628_s5, 2048, %s70_s21, [#allocation9], %s1426_s23, %s1426_s23, %s1427_s24  }
  0x1d   :  { %s1428_s27 = smov [#allocation11]   ;;  %s1429_s29 = smov [#allocation2]  }
  0x1e   :  { %s97_s28 = sshll.u32 %s1428_s27, 4  ;;  %s32_s1 = sshll.u32 %s1429_s29, 4  ;;  %s98_s28 = int_to_ptr.vmem [resolvable:$true] %s97_s28  ;;  %s33_s1 = int_to_ptr.vmem [resolvable:$true] %s32_s1 }
  0x1f   :  { %s1278_s30 = scalar_lea.vmem %s98_s28, 1024  ;;  %p1283_p11 = scmp.lt.s32.totalorder %s98_s28, %s98_s28 }
  0x20   :  { %p1279_p10 = scmp.ne.s32.totalorder %s98_s28, %s1278_s30  ;;  %p1284_p12 = scmp.lt.s32.totalorder %s1278_s30, %s1278_s30 }
  0x22   :  { %p1285_p13 = por %p1284_p12, %p1283_p11 }
  0x24   :  { %p1286_p0 = pnand %p1285_p13, %p1279_p10 }
  0x26   :  { %1289 = shalt.err (!%p1286_p0)
}
  0x27   :  { %103 = dma.hbm_to_vmem [thread:$0]  %s1632_s9, 1024, %s98_s28, [#allocation12], %s1423_s16, %s1423_s16, %s1424_s17  }
  0x28   :  { %s1298_s5 = scalar_lea.vmem %s33_s1, 128  ;;  %p1303_p2 = scmp.lt.s32.totalorder %s33_s1, %s33_s1 }
  0x29   :  { %p1299_p1 = scmp.ne.s32.totalorder %s33_s1, %s1298_s5  ;;  %p1304_p3 = scmp.lt.s32.totalorder %s1298_s5, %s1298_s5 }
  0x2b   :  { %p1305_p4 = por %p1304_p3, %p1303_p2 }
  0x2d   :  { %p1306_p5 = pnand %p1305_p4, %p1299_p1 }
  0x2f   :  { %1309 = shalt.err (!%p1306_p5)
}
  0x30   :  { %35 = dma.hbm_to_vmem [thread:$0]  %s1623_s0, 128, %s33_s1, [#allocation3]  }
  0x31   :  { %s1430_s21 = smov [#allocation7]   ;;  %s1431_s23 = smov [#allocation10]  }
  0x32   :  { %s55_s22 = sshll.u32 %s1430_s21, 4  ;;  %s83_s24 = sshll.u32 %s1431_s23, 4  ;;  %s56_s22 = int_to_ptr.vmem [resolvable:$true] %s55_s22  ;;  %s84_s24 = int_to_ptr.vmem [resolvable:$true] %s83_s24 }
  0x33   :  { %s1318_s25 = scalar_lea.vmem %s56_s22, 1024  ;;  %p1323_p7 = scmp.lt.s32.totalorder %s56_s22, %s56_s22 }
  0x34   :  { %p1319_p6 = scmp.ne.s32.totalorder %s56_s22, %s1318_s25  ;;  %p1324_p8 = scmp.lt.s32.totalorder %s1318_s25, %s1318_s25 }
  0x36   :  { %p1325_p9 = por %p1324_p8, %p1323_p7 }
  0x38   :  { %p1326_p10 = pnand %p1325_p9, %p1319_p6 }
  0x3a   :  { %1329 = shalt.err (!%p1326_p10)
}
  0x3b   :  { %61 = dma.hbm_to_vmem [thread:$0]  %s1626_s3, 1024, %s56_s22, [#allocation6], %s1423_s16, %s1423_s16, %s1424_s17  }
  0x3c   :  { %s1338_s0 = scalar_lea.vmem %s84_s24, 1024  ;;  %p1343_p12 = scmp.lt.s32.totalorder %s84_s24, %s84_s24 }
  0x3d   :  { %p1339_p11 = scmp.ne.s32.totalorder %s84_s24, %s1338_s0  ;;  %p1344_p13 = scmp.lt.s32.totalorder %s1338_s0, %s1338_s0 }
  0x3f   :  { %p1345_p0 = por %p1344_p13, %p1343_p12 }
  0x41   :  { %p1346_p1 = pnand %p1345_p0, %p1339_p11 }
  0x43   :  { %1349 = shalt.err (!%p1346_p1)
}
  0x44   :  { %89 = dma.hbm_to_vmem [thread:$0]  %s1630_s7, 1024, %s84_s24, [#allocation9], %s1423_s16, %s1423_s16, %s1424_s17  }
  0x45   :  { %s1432_s29 = smov [#allocation13]  }
  0x46   :  { %s111_s1 = sshll.u32 %s1432_s29, 4  ;;  %s112_s1 = int_to_ptr.vmem [resolvable:$true] %s111_s1 }
  0x47   :  { %s1358_s30 = scalar_lea.vmem %s112_s1, 1024  ;;  %p1363_p3 = scmp.lt.s32.totalorder %s112_s1, %s112_s1 }
  0x48   :  { %p1359_p2 = scmp.ne.s32.totalorder %s112_s1, %s1358_s30  ;;  %p1364_p4 = scmp.lt.s32.totalorder %s1358_s30, %s1358_s30 }
  0x4a   :  { %p1365_p5 = por %p1364_p4, %p1363_p3 }
  0x4c   :  { %p1366_p6 = pnand %p1365_p5, %p1359_p2 }
  0x4e   :  { %1369 = shalt.err (!%p1366_p6)
}
  0x4f   :  { %117 = dma.hbm_to_vmem [thread:$0]  %s1634_s11, 1024, %s112_s1, [#allocation12], %s1423_s16, %s1423_s16, %s1424_s17  }
  0x50   :  { %1410 = dma.done.wait [#allocation3], 128  }
  0x51   :  { %1411 = vsyncadd [#allocation3], 4294967168 }
  0x52   :  { %1412 = dma.done.wait [#allocation6], 2048  }
  0x53   :  { %1413 = vsyncadd [#allocation6], 4294965248 }
  0x54   :  { %1414 = dma.done.wait [#allocation9], 3072  }
  0x55   :  { %1415 = vsyncadd [#allocation9], 4294964224 }
  0x56   :  { %1416 = dma.done.wait [#allocation12], 2048  }
  0x57   :  { %1417 = vsyncadd [#allocation12], 4294965248  ;;  %v1433_v0 = vmov 0.0   ;;  %vm1434_vm0 = vmmov 0   ;;  %v1158_v1 = vld [vmem:[#allocation5 + $0x38] sm:$0xff]   ;;  %v1159_v2 = vld [vmem:[#allocation5 + $0x30] sm:$0xff]  }
  0x58   :  { %1042 = vmatprep.subr.bf16.mxu0 %v1433_v0  ;;  %1058 = vmatprep.mubr.msk.bf16.mxu0 %vm1434_vm0, %v1433_v0  ;;  %v1160_v3 = vld [vmem:[#allocation5 + $0x28] sm:$0xff]   ;;  %v1166_v4 = vld [vmem:[#allocation7 + $0x38] sm:$0xff]   ;;  %v1161_v5 = vld [vmem:[#allocation5 + $0x20] sm:$0xff]   ;;  %v1435_v43 = vmov 0  }
  0x59   :  { %1062 = vmatprep.subr.bf16.mxu1 %v1433_v0  ;;  %1078 = vmatprep.mubr.msk.bf16.mxu1 %vm1434_vm0, %v1433_v0  ;;  %v1167_v6 = vld [vmem:[#allocation7 + $0x30] sm:$0xff]   ;;  %v1162_v7 = vld [vmem:[#allocation5 + $0x18] sm:$0xff]   ;;  %v1168_v8 = vld [vmem:[#allocation7 + $0x28] sm:$0xff]  }
  0x5a   :  { %1043 = vmatpush3.bf16.msra.mxu0 %v1158_v1  ;;  %1063 = vmatpush3.bf16.msra.mxu1 %v1166_v4  ;;  %v1163_v9 = vld [vmem:[#allocation5 + $0x10] sm:$0xff]   ;;  %v1169_v10 = vld [vmem:[#allocation7 + $0x20] sm:$0xff]   ;;  %v1164_v11 = vld [vmem:[#allocation5 + $0x8] sm:$0xff]  }
  0x5b   :  { %1044 = vmatprep.subr.bf16.mxu0 %v1433_v0  ;;  %1064 = vmatprep.subr.bf16.mxu1 %v1433_v0  ;;  %v1170_v12 = vld [vmem:[#allocation7 + $0x18] sm:$0xff]   ;;  %v1165_v13 = vld [vmem:[#allocation5] sm:$0xff]   ;;  %v1171_v15 = vld [vmem:[#allocation7 + $0x10] sm:$0xff]  }
  0x5c   :  { %v142_v14 = vld [vmem:[#allocation2] sm:$0xff]  ;;  %v1172_v17 = vld [vmem:[#allocation7 + $0x8] sm:$0xff]   ;;  %v1173_v18 = vld [vmem:[#allocation7] sm:$0xff]  }
  0x5d   :  { %v143_v16 = vpack.c.bf16 %v142_v14, %v142_v14  ;;  %v1174_v19 = vld [vmem:[#allocation8 + $0x70] ss:$8 sps:$4 sm:$0xff]   ;;  %v1176_v20 = vld [vmem:[#allocation8 + $0x74] ss:$8 sps:$4 sm:$0xff]   ;;  %v1179_v21 = vld [vmem:[#allocation8 + $0x64] ss:$8 sps:$4 sm:$0xff]  }
  0x5e   :  { %1045 = vmatpush3.bf16.msra.mxu0 %v1159_v2  ;;  %1065 = vmatpush3.bf16.msra.mxu1 %v1167_v6  ;;  %v1177_v22 = vld [vmem:[#allocation8 + $0x60] ss:$8 sps:$4 sm:$0xff]   ;;  %v1182_v23 = vld [vmem:[#allocation8 + $0x54] ss:$8 sps:$4 sm:$0xff]   ;;  %v1180_v24 = vld [vmem:[#allocation8 + $0x50] ss:$8 sps:$4 sm:$0xff]  }
  0x5f   :  { %1046 = vmatprep.subr.bf16.mxu0 %v1433_v0  ;;  %1066 = vmatprep.subr.bf16.mxu1 %v1433_v0  ;;  %v1185_v25 = vld [vmem:[#allocation8 + $0x44] ss:$8 sps:$4 sm:$0xff]   ;;  %v1183_v26 = vld [vmem:[#allocation8 + $0x40] ss:$8 sps:$4 sm:$0xff]   ;;  %v1188_v27 = vld [vmem:[#allocation8 + $0x34] ss:$8 sps:$4 sm:$0xff]  }
  0x60   :  { %v1186_v28 = vld [vmem:[#allocation8 + $0x30] ss:$8 sps:$4 sm:$0xff]   ;;  %v1191_v29 = vld [vmem:[#allocation8 + $0x24] ss:$8 sps:$4 sm:$0xff]   ;;  %v1189_v30 = vld [vmem:[#allocation8 + $0x20] ss:$8 sps:$4 sm:$0xff]  }
  0x61   :  { %v1194_v31 = vld [vmem:[#allocation8 + $0x14] ss:$8 sps:$4 sm:$0xff]   ;;  %v1192_v32 = vld [vmem:[#allocation8 + $0x10] ss:$8 sps:$4 sm:$0xff]   ;;  %v1197_v41 = vld [vmem:[#allocation8 + $0x4] ss:$8 sps:$4 sm:$0xff]  }
  0x62   :  { %1047 = vmatpush3.bf16.msra.mxu0 %v1160_v3  ;;  %1067 = vmatpush3.bf16.msra.mxu1 %v1168_v8  ;;  %v935_v33 = vld [vmem:[%s1625_s2] ss:$0 sm:$0xff]  ;;  %v1195_v42 = vld [vmem:[#allocation8] ss:$8 sps:$4 sm:$0xff]   ;;  %v1199_v45 = vld [vmem:[#allocation10 + $0x30] sm:$0xff]   ;;  %v388_v3 = vlaneseq }
  0x63   :  { %1048 = vmatprep.subr.bf16.mxu0 %v1433_v0  ;;  %1068 = vmatprep.subr.bf16.mxu1 %v1433_v0  ;;  %v1198_v44 = vld [vmem:[#allocation10 + $0x38] sm:$0xff]   ;;  %v1200_v46 = vld [vmem:[#allocation10 + $0x28] sm:$0xff]   ;;  %v1201_v47 = vld [vmem:[#allocation10 + $0x20] sm:$0xff]  }
  0x64   :  { %v1202_v48 = vld [vmem:[#allocation10 + $0x18] sm:$0xff]   ;;  %v1203_v49 = vld [vmem:[#allocation10 + $0x10] sm:$0xff]   ;;  %v1204_v50 = vld [vmem:[#allocation10 + $0x8] sm:$0xff]   ;;  %v389_v4 = vshrl.u32 %v388_v3, 7 }
  0x65   :  { %v944_v51 = vld [vmem:[%s1627_s4] ss:$0 sm:$0xff]  ;;  %v1205_v59 = vld [vmem:[#allocation10] sm:$0xff]   ;;  %v1207_v61 = vld [vmem:[#allocation11 + $0x30] sm:$0xff]  }
  0x66   :  { %1049 = vmatpush3.bf16.msra.mxu0 %v1161_v5  ;;  %1069 = vmatpush3.bf16.msra.mxu1 %v1169_v10  ;;  %v1206_v60 = vld [vmem:[#allocation11 + $0x38] sm:$0xff]   ;;  %v1208_v62 = vld [vmem:[#allocation11 + $0x28] sm:$0xff]   ;;  %v1209_v63 = vld [vmem:[#allocation11 + $0x20] sm:$0xff]   ;;  %v390_v5 = vsub.s32 0, %v389_v4 }
  0x67   :  { %1050 = vmatprep.subr.bf16.mxu0 %v1433_v0  ;;  %1070 = vmatprep.subr.bf16.mxu1 %v1433_v0  ;;  %v1210_v1 = vld [vmem:[#allocation11 + $0x18] sm:$0xff]   ;;  %v1211_v2 = vld [vmem:[#allocation11 + $0x10] sm:$0xff]  }
  0x68   :  { %v386_v6 = vld [vmem:[%s1629_s6] sm:$0x3] }
  0x69   :  { %v391_v8 = vrot.slane %v386_v6, %v390_v5 }
  0x6a   :  { %1051 = vmatpush3.bf16.msra.mxu0 %v1162_v7  ;;  %1071 = vmatpush3.bf16.msra.mxu1 %v1170_v12  ;;  %v394_v7 = vsub.s32 1, %v389_v4 }
  0x6b   :  { %1052 = vmatprep.subr.bf16.mxu0 %v1433_v0  ;;  %1072 = vmatprep.subr.bf16.mxu1 %v1433_v0 }
  0x6e   :  { %1053 = vmatpush3.bf16.msra.mxu0 %v1163_v9  ;;  %1073 = vmatpush3.bf16.msra.mxu1 %v1171_v15  ;;  %v395_v9 = vrot.slane %v386_v6, %v394_v7 }
  0x6f   :  { %1054 = vmatprep.subr.bf16.mxu0 %v1433_v0  ;;  %1074 = vmatprep.subr.bf16.mxu1 %v1433_v0 }
  0x72   :  { %1055 = vmatpush3.bf16.msra.mxu0 %v1164_v11  ;;  %1075 = vmatpush3.bf16.msra.mxu1 %v1172_v17 }
  0x73   :  { %1056 = vmatprep.subr.bf16.mxu0 %v1433_v0  ;;  %1076 = vmatprep.subr.bf16.mxu1 %v1433_v0 }
  0x76   :  { %1057 = vmatpush3.bf16.msra.mxu0 %v1165_v13  ;;  %1077 = vmatpush3.bf16.msra.mxu1 %v1173_v18 }
  0x77   :  { %1082 = vmatprep.subr.bf16.mxu1 %v1433_v0  ;;  %478 = vmatprep.subr.bf16.mxu0 %v1176_v20 }
  0x79   :  { %1059 = vmatmul.mubr.bf16.vlgmr.msra.gmra.mxu0 %v143_v16 }
  0x7a   :  { %479 = vmatpush1.bf16.msra.mxu0 %v1174_v19  ;;  %510 = vmatprep.mubr.bf16.mxu0 %v1435_v43 }
  0x7b   :  { %480 = vmatprep.subr.bf16.mxu0 %v1179_v21 }
  0x7e   :  { %481 = vmatpush1.bf16.msra.mxu0 %v1177_v22 }
  0x7f   :  { %482 = vmatprep.subr.bf16.mxu0 %v1182_v23 }
  0x82   :  { %483 = vmatpush1.bf16.msra.mxu0 %v1180_v24 }
  0x83   :  { %484 = vmatprep.subr.bf16.mxu0 %v1185_v25 }
  0x86   :  { %485 = vmatpush1.bf16.msra.mxu0 %v1183_v26 }
  0x87   :  { %486 = vmatprep.subr.bf16.mxu0 %v1188_v27 }
  0x8a   :  { %487 = vmatpush1.bf16.msra.mxu0 %v1186_v28 }
  0x8b   :  { %488 = vmatprep.subr.bf16.mxu0 %v1191_v29 }
  0x8e   :  { %489 = vmatpush1.bf16.msra.mxu0 %v1189_v30 }
  0x8f   :  { %490 = vmatprep.subr.bf16.mxu0 %v1194_v31  ;;  %v1212_v31 = vld [vmem:[#allocation11 + $0x8] sm:$0xff]  }
  0x92   :  { %491 = vmatpush1.bf16.msra.mxu0 %v1192_v32  ;;  %v1213_v32 = vld [vmem:[#allocation11] sm:$0xff]  }
  0x93   :  { %492 = vmatprep.subr.bf16.mxu0 %v1197_v41 }
  0x96   :  { %493 = vmatpush1.bf16.msra.mxu0 %v1195_v42 }
  0x97   :  { %1102 = vmatprep.subr.bf16.mxu0 %v1433_v0 }
 0x139   :  { %v249_v34 = vpop.f32.mrf.mxu0 }
 0x13a   :  { %v250_v35 = vadd.f32 %v935_v33, %v249_v34  ;;  %v1214_v33 = vld [vmem:[#allocation13 + $0x38] sm:$0xff]   ;;  %v1215_v34 = vld [vmem:[#allocation13 + $0x30] sm:$0xff]  }
 0x13b   :  { %v1060_v36 = vpop.f32.mrf.mxu0 }
 0x13c   :  { %v255_v37 = vmax.f32 %v250_v35, 0.0  ;;  %v1216_v35 = vld [vmem:[#allocation13 + $0x28] sm:$0xff]   ;;  %v1217_v36 = vld [vmem:[#allocation13 + $0x20] sm:$0xff]  }
 0x13d   :  { %v252_v38 = vpop.f32.mrf.mxu0 }
 0x13e   :  { %v256_v39 = vpack.c.bf16 %v255_v37, %v255_v37  ;;  %v1218_v37 = vld [vmem:[#allocation13 + $0x18] sm:$0xff]   ;;  %v1219_v38 = vld [vmem:[#allocation13 + $0x10] sm:$0xff]  }
 0x13f   :  { %v1061_v40 = vpop.f32.mrf.mxu0 }
 0x140   :  { %1079 = vmatmul.mubr.bf16.vlgmr.msra.gmra.mxu1 %v256_v39  ;;  %v969_v39 = vld [vmem:[%s1631_s8] ss:$0 sm:$0xff]  ;;  %s1436_s8 = smov [#allocation14]  }
 0x141   :  { %1098 = vmatprep.mubr.msk.bf16.mxu1 %vm1434_vm0, %v1433_v0  ;;  %1083 = vmatpush3.bf16.msra.mxu1 %v1198_v44  ;;  %s909_s20 = sshll.u32 %s1436_s8, 4  ;;  %s910_s20 = int_to_ptr.vmem [resolvable:$true] %s909_s20 }
 0x142   :  { %1084 = vmatprep.subr.bf16.mxu1 %v1433_v0  ;;  %s1370_s21 = scalar_lea.vmem %s910_s20, 256  ;;  %p1375_p8 = scmp.lt.s32.totalorder %s910_s20, %s910_s20 }
 0x143   :  { %p1371_p7 = scmp.ne.s32.totalorder %s910_s20, %s1370_s21  ;;  %p1376_p9 = scmp.lt.s32.totalorder %s1370_s21, %s1370_s21 }
 0x145   :  { %1085 = vmatpush3.bf16.msra.mxu1 %v1199_v45  ;;  %p1377_p10 = por %p1376_p9, %p1375_p8 }
 0x146   :  { %1086 = vmatprep.subr.bf16.mxu1 %v1433_v0 }
 0x147   :  { %p1378_p11 = pnand %p1377_p10, %p1371_p7 }
 0x149   :  { %1087 = vmatpush3.bf16.msra.mxu1 %v1200_v46 }
 0x14a   :  { %1088 = vmatprep.subr.bf16.mxu1 %v1433_v0 }
 0x14d   :  { %1089 = vmatpush3.bf16.msra.mxu1 %v1201_v47  ;;  %v1220_v47 = vld [vmem:[#allocation13 + $0x8] sm:$0xff]  }
 0x14e   :  { %1090 = vmatprep.subr.bf16.mxu1 %v1433_v0 }
 0x151   :  { %1091 = vmatpush3.bf16.msra.mxu1 %v1202_v48  ;;  %v1221_v48 = vld [vmem:[#allocation13] sm:$0xff]  }
 0x152   :  { %1092 = vmatprep.subr.bf16.mxu1 %v1433_v0 }
 0x155   :  { %1093 = vmatpush3.bf16.msra.mxu1 %v1203_v49  ;;  %v978_v49 = vld [vmem:[%s1633_s10] ss:$0 sm:$0xff] }
 0x156   :  { %1094 = vmatprep.subr.bf16.mxu1 %v1433_v0 }
 0x159   :  { %1095 = vmatpush3.bf16.msra.mxu1 %v1204_v50 }
 0x15a   :  { %1096 = vmatprep.subr.bf16.mxu1 %v1433_v0 }
 0x15d   :  { %1097 = vmatpush3.bf16.msra.mxu1 %v1205_v59 }
 0x15e   :  { %1122 = vmatprep.subr.bf16.mxu1 %v1433_v0 }
 0x200   :  { %v362_v52 = vpop.f32.mrf.mxu1 }
 0x201   :  { %v363_v53 = vadd.f32 %v944_v51, %v362_v52 }
 0x202   :  { %v1080_v54 = vpop.f32.mrf.mxu1 }
 0x203   :  { %v368_v55 = vmax.f32 %v363_v53, 0.0 }
 0x204   :  { %v365_v56 = vpop.f32.mrf.mxu1 }
 0x205   :  { %v369_v57 = vpack.c.bf16 %v368_v55, %v368_v55 }
 0x206   :  { %v1081_v58 = vpop.f32.mrf.mxu1 }
 0x207   :  { %511 = vmatmul.mubr.bf16.vlgmr.msra.gmra.mxu0 %v369_v57 }
 0x208   :  { %1118 = vmatprep.mubr.msk.bf16.mxu0 %vm1434_vm0, %v1433_v0  ;;  %1103 = vmatpush3.bf16.msra.mxu0 %v1206_v60 }
 0x209   :  { %1104 = vmatprep.subr.bf16.mxu0 %v1433_v0 }
 0x20c   :  { %1105 = vmatpush3.bf16.msra.mxu0 %v1207_v61 }
 0x20d   :  { %1106 = vmatprep.subr.bf16.mxu0 %v1433_v0 }
 0x210   :  { %1107 = vmatpush3.bf16.msra.mxu0 %v1208_v62 }
 0x211   :  { %1108 = vmatprep.subr.bf16.mxu0 %v1433_v0 }
 0x214   :  { %1109 = vmatpush3.bf16.msra.mxu0 %v1209_v63 }
 0x215   :  { %1110 = vmatprep.subr.bf16.mxu0 %v1433_v0 }
 0x218   :  { %1111 = vmatpush3.bf16.msra.mxu0 %v1210_v1 }
 0x219   :  { %1112 = vmatprep.subr.bf16.mxu0 %v1433_v0 }
 0x21c   :  { %1113 = vmatpush3.bf16.msra.mxu0 %v1211_v2 }
 0x21d   :  { %1114 = vmatprep.subr.bf16.mxu0 %v1433_v0 }
 0x220   :  { %1115 = vmatpush3.bf16.msra.mxu0 %v1212_v31 }
 0x221   :  { %1116 = vmatprep.subr.bf16.mxu0 %v1433_v0 }
 0x224   :  { %1117 = vmatpush3.bf16.msra.mxu0 %v1213_v32 }
 0x2c7   :  { %v512_v10 = vpop.f32.mrf.mxu0 }
 0x2c8   :  { %v513_v11 = vadd.f32 %v512_v10, %v391_v8 }
 0x2c9   :  { %v514_v12 = vpop.f32.mrf.mxu0 }
 0x2ca   :  { %556 = vst [vmem:[#allocation14] sm:$0xff] %v513_v11  ;;  %v558_v13 = vpack.c.bf16 %v513_v11, %v513_v11  ;;  %v515_v14 = vadd.f32 %v514_v12, %v395_v9 }
 0x2cb   :  { %v516_v15 = vpop.f32.mrf.mxu0 }
 0x2cc   :  { %v525_v16 = vand.u32 2147483647, %v515_v14  ;;  %1099 = vmatmul.mubr.bf16.vlgmr.msra.gmra.mxu1 %v558_v13  ;;  %v523_v28 = vmax.f32 %v515_v14, 0.0 }
 0x2cd   :  { %v517_v17 = vpop.f32.mrf.mxu0  ;;  %1138 = vmatprep.mubr.msk.bf16.mxu1 %vm1434_vm0, %v1433_v0  ;;  %1123 = vmatpush3.bf16.msra.mxu1 %v1214_v33 }
 0x2ce   :  { %v527_v18 = vsub.f32 0.0, %v525_v16  ;;  %1124 = vmatprep.subr.bf16.mxu1 %v1433_v0 }
 0x2d0   :  { %v530_v19 = vmul.f32 1.442695, %v527_v18 }
 0x2d1   :  { %1125 = vmatpush3.bf16.msra.mxu1 %v1215_v34 }
 0x2d2   :  { %1222 = vpow2.f32 %v530_v19  ;;  %1126 = vmatprep.subr.bf16.mxu1 %v1433_v0 }
 0x2d5   :  { %1127 = vmatpush3.bf16.msra.mxu1 %v1216_v35 }
 0x2d6   :  { %1128 = vmatprep.subr.bf16.mxu1 %v1433_v0 }
 0x2d9   :  { %1129 = vmatpush3.bf16.msra.mxu1 %v1217_v36 }
 0x2da   :  { %1130 = vmatprep.subr.bf16.mxu1 %v1433_v0 }
 0x2dd   :  { %1131 = vmatpush3.bf16.msra.mxu1 %v1218_v37 }
 0x2de   :  { %1132 = vmatprep.subr.bf16.mxu1 %v1433_v0 }
 0x2df   :  { %v1223_v20 = vpop.eup %1222 }
 0x2e0   :  { %v541_v21 = vadd.f32 1.0, %v1223_v20  ;;  %v544_v22 = vmul.f32 -0.5, %v1223_v20  ;;  %v547_v24 = vand.u32 2147483647, %v1223_v20 }
 0x2e1   :  { %1133 = vmatpush3.bf16.msra.mxu1 %v1219_v38 }
 0x2e2   :  { %1224 = vlog2.f32 %v541_v21  ;;  %v545_v23 = vadd.f32 1.0, %v544_v22  ;;  %vm548_vm1 = vcmp.lt.f32.partialorder %v547_v24, 0.0004427343  ;;  %1134 = vmatprep.subr.bf16.mxu1 %v1433_v0 }
 0x2e4   :  { %v546_v27 = vmul.f32 %v1223_v20, %v545_v23 }
 0x2e5   :  { %1135 = vmatpush3.bf16.msra.mxu1 %v1220_v47 }
 0x2e6   :  { %1136 = vmatprep.subr.bf16.mxu1 %v1433_v0 }
 0x2e9   :  { %1137 = vmatpush3.bf16.msra.mxu1 %v1221_v48 }
 0x2ef   :  { %v1225_v25 = vpop.eup %1224 }
 0x2f0   :  { %v543_v26 = vmul.f32 0.6931472, %v1225_v25 }
 0x2f2   :  { %v549_v29 = vsel %vm548_vm1, %v546_v27, %v543_v26 }
 0x2f3   :  { %v551_v30 = vadd.f32 %v549_v29, %v523_v28 }
 0x2f5   :  { %557 = vst [vmem:[#allocation14 + $0x8] sm:$0xff] %v551_v30 }
 0x38c   :  { %v664_v40 = vpop.f32.mrf.mxu1 }
 0x38d   :  { %v665_v41 = vadd.f32 %v969_v39, %v664_v40 }
 0x38e   :  { %v1100_v42 = vpop.f32.mrf.mxu1 }
 0x38f   :  { %v670_v43 = vmax.f32 %v665_v41, 0.0 }
 0x390   :  { %v667_v44 = vpop.f32.mrf.mxu1 }
 0x391   :  { %v671_v45 = vpack.c.bf16 %v670_v43, %v670_v43 }
 0x392   :  { %v1101_v46 = vpop.f32.mrf.mxu1 }
 0x393   :  { %1119 = vmatmul.mubr.bf16.vlgmr.msra.gmra.mxu0 %v671_v45 }
 0x453   :  { %v777_v50 = vpop.f32.mrf.mxu0 }
 0x454   :  { %v778_v51 = vadd.f32 %v978_v49, %v777_v50 }
 0x455   :  { %v1120_v52 = vpop.f32.mrf.mxu0 }
 0x456   :  { %v783_v53 = vmax.f32 %v778_v51, 0.0 }
 0x457   :  { %v780_v54 = vpop.f32.mrf.mxu0 }
 0x458   :  { %v784_v55 = vpack.c.bf16 %v783_v53, %v783_v53 }
 0x459   :  { %v1121_v56 = vpop.f32.mrf.mxu0 }
 0x45a   :  { %1139 = vmatmul.mubr.bf16.vlgmr.msra.gmra.mxu1 %v784_v55 }
 0x45b   :  { %1381 = shalt.err (!%p1378_p11)
}
 0x45c   :  { %912 = dma.vmem_to_hbm [thread:$0]  %s910_s20, 256, %s1636_s13, [#allocation4]   ;;  %v987_v0 = vld [vmem:[%s1635_s12] ss:$0 sm:$0xff] }
 0x45d   :  { %s1437_s25 = smov [#allocation15]  }
 0x45e   :  { %s919_s9 = sshll.u32 %s1437_s25, 4  ;;  %s920_s9 = int_to_ptr.vmem [resolvable:$true] %s919_s9 }
 0x45f   :  { %s1390_s13 = scalar_lea.vmem %s920_s9, 128  ;;  %p1395_p13 = scmp.lt.s32.totalorder %s920_s9, %s920_s9 }
 0x460   :  { %p1391_p12 = scmp.ne.s32.totalorder %s920_s9, %s1390_s13  ;;  %p1396_p0 = scmp.lt.s32.totalorder %s1390_s13, %s1390_s13 }
 0x462   :  { %p1397_p1 = por %p1396_p0, %p1395_p13 }
 0x464   :  { %p1398_p2 = pnand %p1397_p1, %p1391_p12 }
 0x51a   :  { %v890_v57 = vpop.f32.mrf.mxu1 }
 0x51b   :  { %v891_v58 = vadd.f32 %v987_v0, %v890_v57 }
 0x51c   :  { %v1140_v59 = vpop.f32.mrf.mxu1 }
 0x51d   :  { %v996_v60 = vmul.f32 -1.442695, %v891_v58 }
 0x51e   :  { %v893_v61 = vpop.f32.mrf.mxu1 }
 0x51f   :  { %1226 = vpow2.f32 %v996_v60 }
 0x520   :  { %v1141_v62 = vpop.f32.mrf.mxu1 }
 0x52c   :  { %v1227_v63 = vpop.eup %1226 }
 0x52d   :  { %v899_v1 = vadd.f32 1.0, %v1227_v63 }
 0x52f   :  { %1228 = vrcp.f32 %v899_v1 }
 0x53c   :  { %v1229_v2 = vpop.eup %1228 }
 0x53d   :  { %902 = vst [vmem:[#allocation15] sm:$0xff] %v1229_v2 }
 0x53e   :  { %1401 = shalt.err (!%p1398_p2)
}
 0x53f   :  { %922 = dma.vmem_to_hbm [thread:$0]  %s920_s9, 128, %s1637_s14, [#allocation16]  }
 0x540   :  { %1418 = dma.done.wait [#allocation4], 256  }
 0x541   :  { %1419 = vsyncadd [#allocation4], 4294967040 }
 0x542   :  { %1420 = dma.done.wait [#allocation16], 128  }
 0x543   :  { %1421 = vsyncadd [#allocation16], 4294967168 }
 0x544   :  { %929 = vsyncpa [#allocation3], 1 }
 0x545   :  { %930 = vsyncpa [#allocation6], 1 }
 0x546   :  { %931 = vsyncpa [#allocation9], 1 }
 0x547   :  { %932 = vsyncpa [#allocation12], 1 }
 0x548   :  { %933 = vsyncpa [#allocation4], 1 }
 0x549   :  { %934 = vsyncpa [#allocation16], 1 }

</bundles_post_ra>
